<compile_context>
chip_gen: v7x
topology: tpu7x:2x2x1
jax: 0.10.0
libtpu: 0.0.40
codegen_flags: <defaults>
</compile_context>

<pallas_src>
import jax
import jax.numpy as jnp
from jax.experimental import pallas as pl
from jax.experimental.pallas import tpu as pltpu

# cfg.CLASSIFIER.SEGHEAD.COSINE.* values — chosen deterministically in-script.
WEIGHT_NORM = False      # -> forward normalizes the class weights (cosine path)
TRAIN_SCALE_FACTOR = 30.0
VAL_SCALE_FACTOR = 10.0


def _round_up(a, b):
    return (a + b - 1) // b * b


# ---------------------------------------------------------------------------
# Pallas kernel: per-pixel L2 normalize + cosine matmul against the
# pre-normalized, pre-scaled class weights.  Layout: channels on sublanes,
# pixels on lanes, classes on output sublanes (lane-dense output).
# ---------------------------------------------------------------------------
def _cos_kernel(x_ref, w_ref, o_ref):
    # x_ref: (C, T)   w_ref: (K, C) already L2-normalized per class * scale
    # o_ref: (K, T)
    x = x_ref[...]                                           # f32
    ssq = jnp.sum(x * x, axis=0, keepdims=True)              # (1, T) per-pixel ||x||^2
    # exact 1/(||x|| + 1e-5); use approx=True (EUP) if a looser tolerance is ok.
    inv = pl.reciprocal(jnp.sqrt(ssq) + 1e-5, approx=False)
    x_n = x * inv                                            # broadcast over sublanes
    o_ref[...] = jnp.dot(
        w_ref[...], x_n, preferred_element_type=jnp.float32
    ).astype(o_ref.dtype)


def cos_scores_pallas(x_flat, w_scaled, max_tile_hw=2048):
    """x_flat: (B, C, HW) f32, w_scaled: (K, C) f32 -> (B, K, HW) f32."""
    B, C, HW = x_flat.shape
    K = w_scaled.shape[0]

    # Lane-dense pixel tile, as large as is sensible.
    tile = min(max_tile_hw, _round_up(HW, 128))
    tile = _round_up(tile, 128)
    # Keep the double-buffered x block under ~8 MiB (safe on v7x's 64 MiB VMEM).
    tile_cap = max(128, ((8 << 20) // (2 * 4 * C)) // 128 * 128)
    tile = min(tile, tile_cap)

    HW_pad = _round_up(HW, tile)
    if HW_pad != HW:
        # zero padding is safe: 0 / (0 + 1e-5) = 0 -> zero scores, sliced off below.
        x_flat = jnp.pad(x_flat, ((0, 0), (0, 0), (0, HW_pad - HW)))

    grid = (B, HW_pad // tile)

    # Explicit VMEM budget only when the (double-buffered) blocks get large.
    bytes_per_step = 4 * (2 * C * tile + 2 * K * tile + 2 * K * C)
    cp_kwargs = dict(dimension_semantics=("parallel", "parallel"))
    if bytes_per_step > (24 << 20):
        cp_kwargs["vmem_limit_bytes"] = int(min(bytes_per_step + (8 << 20), 60 << 20))

    out = pl.pallas_call(
        _cos_kernel,
        out_shape=jax.ShapeDtypeStruct((B, K, HW_pad), jnp.float32),
        grid_spec=pltpu.PrefetchScalarGridSpec(
            num_scalar_prefetch=0,
            grid=grid,
            in_specs=[
                pl.BlockSpec((None, C, tile), lambda b, t: (b, 0, t)),  # pixel tile
                pl.BlockSpec((K, C), lambda b, t: (0, 0)),              # full weight
            ],
            out_specs=pl.BlockSpec((None, K, tile), lambda b, t: (b, 0, t)),
        ),
        compiler_params=pltpu.CompilerParams(**cp_kwargs),
    )(x_flat, w_scaled)

    if HW_pad != HW:
        out = out[:, :, :HW]
    return out


# ---------------------------------------------------------------------------
# Bilinear interpolation (F.interpolate, mode='bilinear', align_corners=False)
# as two gathers + lerps per axis (plain-JAX glue; 2 taps per output pixel).
# ---------------------------------------------------------------------------
def _axis_interp(out_size, in_size):
    i = jnp.arange(out_size, dtype=jnp.float32)
    src = (i + 0.5) * (in_size / out_size) - 0.5
    src = jnp.maximum(src, 0.0)                          # PyTorch clamps negative src
    i0 = jnp.minimum(jnp.floor(src).astype(jnp.int32), in_size - 1)
    i1 = jnp.minimum(i0 + 1, in_size - 1)
    w1 = src - i0.astype(jnp.float32)
    return i0, i1, w1


def _bilinear_resize_nchw(x, out_h, out_w):
    B, C, H, W = x.shape
    h0, h1, wh1 = _axis_interp(out_h, H)
    c0, c1, wc1 = _axis_interp(out_w, W)
    xh = (x[:, :, h0, :] * (1.0 - wh1)[None, None, :, None]
          + x[:, :, h1, :] * wh1[None, None, :, None])
    out = (xh[:, :, :, c0] * (1.0 - wc1)[None, None, None, :]
           + xh[:, :, :, c1] * wc1[None, None, None, :])
    return out


# ---------------------------------------------------------------------------
# seg_cos forward
# ---------------------------------------------------------------------------
def seg_cos_forward(x_nchw, weight, size_, training=False):
    """
    x_nchw: (B, C, H, W) float32   (NCHW, matching the PyTorch module)
    weight: (K, C, 1, 1) float32   (nn.Conv2d(C, K, 1, bias=False).weight)
    size_:  (H_out, W_out)
    """
    B, C, H, W = x_nchw.shape
    K = weight.shape[0]
    scale = TRAIN_SCALE_FACTOR if training else VAL_SCALE_FACTOR

    # Fold the per-class L2 normalization and the scale into the tiny weight once.
    w = weight.reshape(K, C)
    w_norm = jnp.sqrt(jnp.sum(w * w, axis=1, keepdims=True))
    w_scaled = (w / (w_norm + 1e-5)) * scale                 # (K, C)

    # NCHW is already (B, C, H*W)-contiguous: this reshape is free (no transpose).
    x_flat = x_nchw.reshape(B, C, H * W)
    scores = cos_scores_pallas(x_flat, w_scaled).reshape(B, K, H, W)

    Ho, Wo = size_
    return _bilinear_resize_nchw(scores, Ho, Wo)


# ---------------------------------------------------------------------------
# Pure-JAX reference (for correctness check only)
# ---------------------------------------------------------------------------
def _bilinear_matrix(out_size, in_size):
    i = jnp.arange(out_size, dtype=jnp.float32)
    src = (i + 0.5) * (in_size / out_size) - 0.5
    src = jnp.maximum(src, 0.0)
    i0 = jnp.minimum(jnp.floor(src).astype(jnp.int32), in_size - 1)
    i1 = jnp.minimum(i0 + 1, in_size - 1)
    w1 = src - i0.astype(jnp.float32)
    w0 = 1.0 - w1
    M = jnp.zeros((out_size, in_size), jnp.float32)
    rows = jnp.arange(out_size)
    M = M.at[rows, i0].add(w0)
    M = M.at[rows, i1].add(w1)
    return M


def _reference(x_nchw, weight, size_, training=False):
    scale = TRAIN_SCALE_FACTOR if training else VAL_SCALE_FACTOR
    x_norm = jnp.sqrt(jnp.sum(x_nchw * x_nchw, axis=1, keepdims=True))
    x_n = x_nchw / (x_norm + 1e-5)
    w = weight.reshape(weight.shape[0], weight.shape[1])
    w_norm = jnp.sqrt(jnp.sum(w * w, axis=1, keepdims=True))
    w_n = w / (w_norm + 1e-5)
    cos = jnp.einsum('bchw,kc->bkhw', x_n, w_n)
    scores = scale * cos
    Ho, Wo = size_
    Mh = _bilinear_matrix(Ho, x_nchw.shape[2])
    Mw = _bilinear_matrix(Wo, x_nchw.shape[3])
    return jnp.einsum('ih,bchw,jw->bcij', Mh, scores, Mw)


if __name__ == "__main__":
    B, C, H, W = 2, 32, 16, 16
    num_classes = 8
    size_ = (32, 32)

    key = jax.random.PRNGKey(0)
    kx, kw = jax.random.split(key)
    x = jax.random.normal(kx, (B, C, H, W), dtype=jnp.float32)
    weight = jax.random.normal(kw, (num_classes, C, 1, 1), dtype=jnp.float32) * 0.1

    out = seg_cos_forward(x, weight, size_, training=False)
    out = jax.block_until_ready(out)

    ref = _reference(x, weight, size_, training=False)
    assert out.shape == (B, num_classes, size_[0], size_[1])
    assert jnp.allclose(out, ref, atol=1e-4, rtol=1e-4), "mismatch vs reference"

    print("KERNEL_OK")
</pallas_src>

<mosaic_0001>
module attributes {stable_mosaic.version = 11 : i64} {
  func.func @_cos_kernel(%arg0: i32, %arg1: i32, %arg2: memref<1x32x256xf32, #tpu.memory_space<vmem>>, %arg3: memref<8x32xf32, #tpu.memory_space<vmem>>, %arg4: memref<1x8x256xf32, #tpu.memory_space<vmem>>) attributes {dimension_semantics = [#tpu.dimension_semantics<parallel>, #tpu.dimension_semantics<parallel>], iteration_bounds = array<i64: 2, 1>, scalar_prefetch = 0 : i64, scratch_operands = 0 : i64, tpu.core_type = #tpu.core_type<tc>, window_params = [{transform_indices = @transform_0, window_bounds = array<i64: 1, 32, 256>}, {pipeline_mode = #tpu.pipeline_mode<synchronous>, transform_indices = @transform_1, window_bounds = array<i64: 8, 32>}, {transform_indices = @transform_2, window_bounds = array<i64: 1, 8, 256>}]} {
    %c0 = arith.constant 0 : index
    %c0_0 = arith.constant 0 : index
    %c0_1 = arith.constant 0 : index
    %0 = vector.load %arg2[%c0, %c0_0, %c0_1] : memref<1x32x256xf32, #tpu.memory_space<vmem>>, vector<1x32x256xf32>
    %1 = vector.shape_cast %0 : vector<1x32x256xf32> to vector<32x256xf32>
    %2 = arith.mulf %1, %1 : vector<32x256xf32>
    %cst = arith.constant dense<0.000000e+00> : vector<256xf32>
    %3 = vector.multi_reduction <add>, %2, %cst [0] : vector<32x256xf32> to vector<256xf32>
    %4 = vector.shape_cast %3 : vector<256xf32> to vector<1x256xf32>
    %5 = math.sqrt %4 : vector<1x256xf32>
    %cst_2 = arith.constant 9.99999974E-6 : f32
    %6 = vector.broadcast %cst_2 : f32 to vector<1x256xf32>
    %7 = arith.addf %5, %6 : vector<1x256xf32>
    %8 = tpu.reciprocal %7 : vector<1x256xf32> -> vector<1x256xf32>
    %9 = vector.broadcast %8 : vector<1x256xf32> to vector<32x256xf32>
    %10 = arith.mulf %1, %9 : vector<32x256xf32>
    %c0_3 = arith.constant 0 : index
    %c0_4 = arith.constant 0 : index
    %11 = vector.load %arg3[%c0_3, %c0_4] : memref<8x32xf32, #tpu.memory_space<vmem>>, vector<8x32xf32>
    %cst_5 = arith.constant dense<0.000000e+00> : vector<8x256xf32>
    %12 = tpu.matmul %11, %10, %cst_5 {dimension_numbers = #tpu.dot_dimension_numbers<[1], [0], [0], [1], [0, 0, 1, 1], [], []>} : vector<8x32xf32>, vector<32x256xf32>, vector<8x256xf32> -> vector<8x256xf32>
    %c0_6 = arith.constant 0 : index
    %c0_7 = arith.constant 0 : index
    %c0_8 = arith.constant 0 : index
    %13 = vector.load %arg4[%c0_6, %c0_7, %c0_8] : memref<1x8x256xf32, #tpu.memory_space<vmem>>, vector<1x8x256xf32>
    %14 = vector.shape_cast %13 : vector<1x8x256xf32> to vector<8x256xf32>
    %15 = vector.shape_cast %12 : vector<8x256xf32> to vector<1x8x256xf32>
    tpu.vector_store %arg4[%c0_6, %c0_7, %c0_8], %15 {strides = array<i32>} : memref<1x8x256xf32, #tpu.memory_space<vmem>>, vector<1x8x256xf32>,
    return
  }
  func.func @transform_0(%arg0: i32, %arg1: i32) -> (i32, i32, i32) {
    %c0_i32 = arith.constant 0 : i32
    %c0_i32_0 = arith.constant 0 : i32
    return %arg0, %c0_i32, %arg1 : i32, i32, i32
  }
  func.func @transform_1(%arg0: i32, %arg1: i32) -> (i32, i32) {
    %c0_i32 = arith.constant 0 : i32
    %c0_i32_0 = arith.constant 0 : i32
    %c0_i32_1 = arith.constant 0 : i32
    return %c0_i32, %c0_i32_0 : i32, i32
  }
  func.func @transform_2(%arg0: i32, %arg1: i32) -> (i32, i32, i32) {
    %c0_i32 = arith.constant 0 : i32
    %c0_i32_0 = arith.constant 0 : i32
    return %arg0, %c0_i32, %arg1 : i32, i32, i32
  }
}

</mosaic_0001>

<bundles_post_ra>
// kernel: tpu_custom_call.1
= control target key start
LH: loop header
LB: loop body
LE: loop exit
PB: predicated region body
PF: predicated region fallthrough
CT: control target
= control target key end

     0   :  { %7 = vsyncpa [#allocation3], 0  ;;  %s943_s0 = inlined_call_operand.hbm [shape: f32[2,32,256], index: 0, kind: input, shape index: {}]   ;;  %s944_s1 = inlined_call_operand.hbm [shape: f32[8,32], index: 1, kind: input, shape index: {}]   ;;  %s945_s2 = inlined_call_operand.hbm [shape: f32[2,8,256], index: 2, kind: output, shape index: {}]  }
   0x1   :  { %9 = vsyncpa [#allocation3 + $0x1], 0 }
   0x2   :  { %10 = vsyncpa [#allocation6], 0 }
   0x3   :  { %11 = vsyncpa [#allocation4], 0 }
   0x4   :  { %13 = vsyncpa [#allocation4 + $0x1], 0  ;;  %s723_s9 = smov 0   ;;  %s725_s10 = smov 0  }
   0x5   :  { %s727_s11 = smov 0   ;;  %s729_s12 = smov 0  }
   0x6   :  { %s731_s13 = smov 0   ;;  %s733_s14 = smov 0  }
   0x7 LB: > { %s444_s15 = sadd.s32 4294967295, %s700_s14   ;;  %s445_s16 = sadd.s32 4294967294, %s700_s14   ;;  %s700_s14 = sphi %s733_s14, %s19_s14   ;;  %s696_s13 = sphi %s731_s13, %s973_s13   ;;  %s692_s12 = sphi %s729_s12, %s972_s12   ;;  %s688_s11 = sphi %s727_s11, %s971_s11   ;;  %s684_s10 = sphi %s725_s10, %s970_s10   ;;  %s680_s9 = sphi %s723_s9, %s969_s9  }
   0x8   : > { %s40_s17 = sadd.s32 1, %s688_s11  ;;  %p47_p0 = scmp.ne.s32.totalorder %s688_s11, %s684_s10 }
   0x9   : > { %p48_p1 = scmp.eq.s32.totalorder %s700_s14, 0  ;;  %p53_p2 = scmp.ne.s32.totalorder %s684_s10, %s680_s9 }
   0xa   : > { %p761_p3 = scmp.eq.s32.totalorder %s444_s15, 0  ;;  %p100_p4 = scmp.eq.s32.totalorder %s444_s15, 1 }
   0xb   : > { %p765_p5 = por %p48_p1, %p47_p0  ;;  %p106_p6 = scmp.eq.s32.totalorder %s445_s16, 1 }
   0xc   : > { %s952_s18 = scalar_select %p761_p3, 1, 0 }
   0xd   : > { %p771_p7 = por %p761_p3, %p53_p2  ;;  %p775_p8 = por %p100_p4, %p47_p0 }
   0xe   : > { %p779_p9 = por %p106_p6, %p53_p2  ;;  %p446_p10 = scmp.ge.s32.totalorder %s700_s14, 1 }
   0xf   : > { %s954_s20 = scalar_select %p771_p7, 1, 0 }
  0x10   : > { %s955_s21 = scalar_select %p775_p8, 1, 0 }
  0x11   : > { %s956_s22 = scalar_select %p779_p9, 1, 0 }
  0x12   : > { %p113_p11 = scmp.lt.s32.totalorder %s700_s14, 3  ;;  %s702_s24 = smov [#allocation5]  }
  0x13   : > { %s126_s25 = sshll.u32 %s702_s24, 4  ;;  %p493_p1 = scmp.lt.s32.totalorder %s700_s14, 2  ;;  %s127_s25 = int_to_ptr.vmem [resolvable:$true] %s126_s25 }
  0x14   : > { %p786_p13 = pnand %p446_p10, %p113_p11  ;;  %s31_s28 = sadd.s32 1, %s696_s13 }
  0x15   : > { %p795_p4 = pnand %p493_p1, %p765_p5  ;;  %p806_p6 = scmp.ge.s32.totalorder %s31_s28, 2 }
  0x16   : > { %s957_s23 = scalar_select %p786_p13, 1, 0 }
  0x17   : > { %p480_p0 = pneg %p786_p13  ;;  %s137_s30 = sand.u32 1, %s688_s11  }
  0x18   : > { %s958_s26 = scalar_select %p795_p4, 1, 0 }
  0x19   : > { %p801_p2 = pnand %p480_p0, %p761_p3  ;;  %s556_s5 = scalar_lea.hbm %s944_s1, 128 }
  0x1a   : > { %s960_s29 = scalar_select %p806_p6, 1, 0 }
  0x1b   : > { %p557_p5 = scmp.ne.s32.totalorder %s944_s1, %s556_s5  ;;  %p558_p10 = pneg %p801_p2 }
  0x1c   : > { %p563_p0 = scmp.lt.u32.totalorder %s556_s5, %s944_s1 }
  0x1d   : > { %p559_p11 = pnand %p558_p10, %p557_p5 }
  0x1f   : > { %p560_p1 = pneg %p559_p11 }
  0x21   : > { %p565_p12 = pnand %p563_p0, %p560_p1 }
  0x23   : > { %568 = shalt.err (!%p565_p12)
}
  0x24   : > { %s569_s16 = scalar_lea.vmem %s127_s25, 128  ;;  %p577_p7 = scmp.lt.s32.totalorder %s127_s25, %s127_s25 }
  0x25   : > { %p570_p9 = scmp.ne.s32.totalorder %s127_s25, %s569_s16  ;;  %p578_p13 = scmp.lt.s32.totalorder %s569_s16, %s569_s16 }
  0x27   : > { %p572_p8 = pnand %p570_p9, %p558_p10  ;;  %p579_p4 = por %p578_p13, %p577_p7 }
  0x29   : > { %p573_p3 = pneg %p572_p8 }
  0x2b   : > { %p580_p6 = pnand %p579_p4, %p573_p3 }
  0x2d   : > { %583 = shalt.err (!%p580_p6)
}
  0x2e   : > { %483 = dma.hbm_to_vmem [thread:$0]  (!%p801_p2), %s944_s1, 128, %s127_s25, [#allocation6]  }
  0x2f   : > { %p961_p9 = scmp.ne.s32.totalorder %s960_s29, 0  ;;  %s449_s3 = sshll.u32 %s137_s30, 6 }
  0x30   : > { %s462_s5 = sshll.u32 %s696_s13, 10  ;;  %s141_s8 = scalar_lea.vmem [#allocation2], %s449_s3 }
  0x31   : > { %s975_s28 = smov (%p961_p9, %s31_s28), 0  ;;  %s837_s7 = scalar_lea.hbm %s943_s0, %s462_s5 }
  0x32   : > { %s35_s4 = ssub.s32 %s696_s13, %s975_s28  ;;  %s150_s15 = sshll.u32 %s141_s8, 4  ;;  %s844_s15 = int_to_ptr.vmem [resolvable:$true] %s150_s15 }
  0x33   : > { %p38_p3 = scmp.eq.s32.totalorder %s35_s4, 0  ;;  %s846_s29 = scalar_lea.sflag [#allocation3], %s137_s30 }
  0x34   : > { %s584_s16 = scalar_lea.hbm %s837_s7, 1024  ;;  %p962_p8 = scmp.ne.s32.totalorder %s958_s26, 0 }
  0x35   : > { %s842_s25 = scalar_select %p38_p3, %s688_s11, %s40_s17  }
  0x36   : > { %p585_p7 = scmp.ne.s32.totalorder %s837_s7, %s584_s16  ;;  %p586_p12 = pneg %p962_p8 }
  0x37   : > { %s589_s3 = scalar_lea.hbm %s943_s0, 2048  ;;  %p590_p2 = scmp.lt.u32.totalorder %s837_s7, %s943_s0 }
  0x38   : > { %p587_p13 = pnand %p586_p12, %p585_p7  ;;  %p591_p6 = scmp.lt.u32.totalorder %s589_s3, %s584_s16 }
  0x39   : > { %p593_p10 = scmp.lt.u32.totalorder %s584_s16, %s837_s7 }
  0x3a   : > { %p588_p4 = pneg %p587_p13  ;;  %p592_p5 = por %p591_p6, %p590_p2 }
  0x3c   : > { %p594_p11 = por %p593_p10, %p592_p5 }
  0x3e   : > { %p595_p1 = pnand %p594_p11, %p588_p4 }
  0x40   : > { %598 = shalt.err (!%p595_p1)
}
  0x41   : > { %s599_s17 = scalar_lea.vmem %s844_s15, 1024  ;;  %s703_s30 = smov [#allocation2]  }
  0x42   : > { %p600_p0 = scmp.ne.s32.totalorder %s844_s15, %s599_s17  ;;  %s604_s27 = sshll.u32 %s703_s30, 4  ;;  %s605_s27 = int_to_ptr.vmem [resolvable:$false] %s604_s27 }
  0x43   : > { %s606_s6 = scalar_lea.vmem %s605_s27, 2048  ;;  %p607_p7 = scmp.lt.s32.totalorder %s844_s15, %s605_s27 }
  0x44   : > { %p602_p9 = pnand %p600_p0, %p586_p12  ;;  %p608_p13 = scmp.lt.s32.totalorder %s606_s6, %s599_s17 }
  0x46   : > { %p603_p3 = pneg %p602_p9  ;;  %p609_p2 = por %p608_p13, %p607_p7 }
  0x48   : > { %p610_p6 = pnand %p609_p2, %p603_p3 }
  0x4a   : > { %613 = shalt.err (!%p610_p6)
}
  0x4b   : > { %s704_s8 = smov 256   ;;  %s705_s16 = smov 16  }
  0x4c   : > { %487 = dma.hbm_to_vmem [thread:$0]  (!%p962_p8), %s837_s7, 1024, %s844_s15, %s846_s29, %s704_s8, %s704_s8, %s705_s16  }
  0x4d   : > { %p963_p12 = scmp.ne.s32.totalorder %s957_s23, 0 }
  0x4e   : > { %s877_s19 = sand.u32 (!%p963_p12), 1, %s684_s10   ;;  %p964_p4 = scmp.ne.s32.totalorder (!%p963_p12), %s954_s20, 0 }
  0x4f   : > { %162 = sbr.rel (%p963_p12) target bundleno = 379 (0x17b), region = 28  ;;  %s453_s24 = sshll.u32 (!%p963_p12), %s877_s19, 6 }
  0x50   : > { %s165_s3 = scalar_lea.sflag (!%p963_p12), [#allocation3], %s877_s19  ;;  %s168_s4 = scalar_lea.vmem (!%p963_p12), [#allocation2], %s453_s24 }
  0x56   : > { %667 = dma.done.wait (%p964_p4), %s165_s3, 1024  }
  0x57   : > { %669 = vsyncadd (%p964_p4), %s165_s3, 4294966272  ;;  %p965_p5 = scmp.ne.s32.totalorder %s952_s18, 0 }
  0x59   : > { %671 = dma.done.wait (%p965_p5), [#allocation6], 128  }
  0x5a   : > { %673 = vsyncadd (%p965_p5), [#allocation6], 4294967168  ;;  %v706_v0 = vmov 0.0   ;;  %v196_v1 = vld [vmem:[%s168_s4 + $0x8] sm:$0xff]  ;;  %v198_v2 = vld [vmem:[%s168_s4 + $0x18] sm:$0xff]  ;;  %vm256_vm4 = vcmask 261120  }
  0x5b   : > { %324 = vmatprep.mubr.f32.mxu0 %v706_v0  ;;  %v200_v3 = vld [vmem:[%s168_s4 + $0x28] sm:$0xff]  ;;  %v202_v4 = vld [vmem:[%s168_s4 + $0x38] sm:$0xff]  ;;  %v204_v5 = vmul.f32 %v196_v1, %v196_v1  ;;  %v206_v6 = vmul.f32 %v198_v2, %v198_v2  ;;  %v195_v8 = vld [vmem:[%s168_s4] sm:$0xff]  ;;  %s455_s18 = sshll.u32 %s877_s19, 4  ;;  %s463_s26 = sshll.u32 %s692_s12, 8 }
  0x5c   : > { %v208_v7 = vmul.f32 %v200_v3, %v200_v3  ;;  %v197_v9 = vld [vmem:[%s168_s4 + $0x10] sm:$0xff]  ;;  %v199_v10 = vld [vmem:[%s168_s4 + $0x20] sm:$0xff]  ;;  %v203_v12 = vmul.f32 %v195_v8, %v195_v8  ;;  %v210_v14 = vmul.f32 %v202_v4, %v202_v4  ;;  %s192_s20 = scalar_lea.vmem [#allocation7], %s455_s18  ;;  %s896_s29 = scalar_lea.hbm %s945_s2, %s463_s26 }
  0x5d   : > { %v201_v11 = vld [vmem:[%s168_s4 + $0x30] sm:$0xff]  ;;  %v205_v13 = vmul.f32 %v197_v9, %v197_v9  ;;  %v220_v15 = vadd.f32 %v206_v6, %v204_v5  ;;  %v207_v16 = vmul.f32 %v199_v10, %v199_v10  ;;  %v255_v61 = vld [vmem:[#allocation5] sm:$0xff]  ;;  %s350_s23 = sshll.u32 %s192_s20, 4  ;;  %s334_s5 = scalar_lea.sflag [#allocation4], %s877_s19  ;;  %s891_s23 = int_to_ptr.vmem [resolvable:$true] %s350_s23 }
  0x5e   : > { %v209_v17 = vmul.f32 %v201_v11, %v201_v11  ;;  %s614_s17 = scalar_lea.vmem %s891_s23, 256  ;;  %p966_p10 = scmp.ne.s32.totalorder %s955_s21, 0 }
  0x5f   : > { %v211_v18 = vadd.f32 %v205_v13, %v203_v12  ;;  %v221_v19 = vadd.f32 %v220_v15, %v208_v7  ;;  %p615_p8 = scmp.ne.s32.totalorder %s891_s23, %s614_s17  ;;  %s707_s12 = smov [#allocation7]  }
  0x60   : > { %s618_s30 = sshll.u32 %s707_s12, 4  ;;  %s619_s30 = int_to_ptr.vmem [resolvable:$false] %s618_s30 }
  0x61   : > { %v212_v20 = vadd.f32 %v211_v18, %v207_v16  ;;  %v222_v21 = vadd.f32 %v221_v19, %v210_v14  ;;  %p616_p11 = pnand %p615_p8, %p966_p10  ;;  %s620_s27 = scalar_lea.vmem %s619_s30, 512 }
  0x62   : > { %p621_p0 = scmp.lt.s32.totalorder %s891_s23, %s619_s30  ;;  %p622_p9 = scmp.lt.s32.totalorder %s620_s27, %s614_s17 }
  0x63   : > { %v213_v22 = vadd.f32 %v212_v20, %v209_v17  ;;  %v223_v23 = vrot.slane %v222_v21, 4  ;;  %p617_p1 = pneg %p616_p11 }
  0x64   : > { %p623_p3 = por %p622_p9, %p621_p0 }
  0x65   : > { %v214_v24 = vrot.slane %v213_v22, 4  ;;  %v224_v25 = vadd.f32 %v223_v23, %v222_v21 }
  0x66   : > { %p624_p7 = pnand %p623_p3, %p617_p1 }
  0x67   : > { %v215_v26 = vadd.f32 %v214_v24, %v213_v22  ;;  %v225_v27 = vrot.slane %v224_v25, 2 }
  0x69   : > { %v216_v28 = vrot.slane %v215_v26, 2  ;;  %v226_v29 = vadd.f32 %v225_v27, %v224_v25 }
  0x6b   : > { %v217_v30 = vadd.f32 %v216_v28, %v215_v26  ;;  %v227_v31 = vrot.slane %v226_v29, 1 }
  0x6d   : > { %v218_v32 = vrot.slane %v217_v30, 1  ;;  %v228_v33 = vadd.f32 %v227_v31, %v226_v29 }
  0x6f   : > { %v219_v34 = vadd.f32 %v218_v32, %v217_v30  ;;  %548 = vrsqrt.f32 %v228_v33  ;;  %vm238_vm0 = vcmp.eq.f32.partialorder %v228_v33, inf  ;;  %v241_v36 = vand.u32 2147483648, %v228_v33 }
  0x70   : > { %vm240_vm1 = vcmp.eq.f32.partialorder %v228_v33, 0.0 }
  0x71   : > { %550 = vrsqrt.f32 %v219_v34  ;;  %vm231_vm2 = vcmp.eq.f32.partialorder %v219_v34, inf  ;;  %v234_v39 = vand.u32 2147483648, %v219_v34  ;;  %vm233_vm3 = vcmp.eq.f32.partialorder %v219_v34, 0.0 }
  0x79   : > { %v549_v35 = vpop.eup %548 }
  0x7a   : > { %v237_v38 = vmul.f32 %v549_v35, %v228_v33 }
  0x7b   : > { %v551_v37 = vpop.eup %550 }
  0x7c   : > { %v230_v40 = vmul.f32 %v551_v37, %v219_v34  ;;  %v239_v41 = vsel %vm238_vm0, %v228_v33, %v237_v38 }
  0x7d   : > { %v242_v42 = vsel %vm240_vm1, %v241_v36, %v239_v41 }
  0x7e   : > { %v232_v43 = vsel %vm231_vm2, %v219_v34, %v230_v40  ;;  %v244_v44 = vadd.f32 1e-05, %v242_v42 }
  0x7f   : > { %v235_v45 = vsel %vm233_vm3, %v234_v39, %v232_v43 }
  0x80   : > { %v243_v46 = vadd.f32 1e-05, %v235_v45  ;;  %552 = vrcp.f32 %v244_v44 }
  0x82   : > { %554 = vrcp.f32 %v243_v46 }
  0x8a   : > { %v553_v47 = vpop.eup %552 }
  0x8b   : > { %v248_v49 = vmul.f32 %v553_v47, %v196_v1  ;;  %v250_v50 = vmul.f32 %v553_v47, %v198_v2  ;;  %v252_v51 = vmul.f32 %v553_v47, %v200_v3  ;;  %v254_v52 = vmul.f32 %v553_v47, %v202_v4 }
  0x8c   : > { %v555_v48 = vpop.eup %554 }
  0x8d   : > { %v247_v53 = vmul.f32 %v555_v48, %v195_v8  ;;  %v249_v54 = vmul.f32 %v555_v48, %v197_v9  ;;  %v251_v55 = vmul.f32 %v555_v48, %v199_v10  ;;  %v253_v56 = vmul.f32 %v555_v48, %v201_v11 }
  0x8e   : > { %v464_v57 = vpack.c.bf16 %v250_v50, %v248_v49  ;;  %v468_v58 = vpack.c.bf16 %v254_v52, %v252_v51 }
  0x8f   : > { %v466_v59 = vpack.c.bf16 %v249_v54, %v247_v53  ;;  %v470_v60 = vpack.c.bf16 %v253_v56, %v251_v55 }
  0x90   : > { %465 = vmatprep.subr.bf16.mxu0 %v464_v57 }
  0x91   : > { %467 = vmatpush1.bf16.msra.mxu0 %v466_v59 }
  0x92   : > { %469 = vmatprep.subr.bf16.mxu0 %v468_v58 }
  0x95   : > { %471 = vmatpush1.bf16.msra.mxu0 %v470_v60 }
  0x98   : > { %456 = vmatmul.mubr.msk.f32.vlgmr.msra.gmra.mrb[0].mxu0 %vm256_vm4, %v255_v61 }
 0x16b   : > { %v326_v62 = vpop.f32.mrb[0].mxu0 }
 0x16c   : > { %331 = vst [vmem:[%s192_s20] sm:$0xff] %v326_v62  ;;  %v328_v63 = vpop.f32.mrb[1].mxu0 }
 0x16d   : > { %332 = vst [vmem:[%s192_s20 + $0x8] sm:$0xff] %v328_v63 }
 0x16e   : > { %627 = shalt.err (!%p624_p7)
}
 0x16f   : > { %s628_s6 = scalar_lea.hbm %s896_s29, 256  ;;  %s632_s19 = scalar_lea.hbm %s945_s2, 512 }
 0x170   : > { %p629_p13 = scmp.ne.s32.totalorder %s896_s29, %s628_s6  ;;  %p633_p12 = scmp.lt.u32.totalorder %s896_s29, %s945_s2 }
 0x171   : > { %p634_p4 = scmp.lt.u32.totalorder %s632_s19, %s628_s6  ;;  %p636_p8 = scmp.lt.u32.totalorder %s628_s6, %s896_s29 }
 0x172   : > { %p630_p2 = pnand %p629_p13, %p966_p10 }
 0x173   : > { %p635_p5 = por %p634_p4, %p633_p12 }
 0x174   : > { %p631_p6 = pneg %p630_p2 }
 0x175   : > { %p637_p11 = por %p636_p8, %p635_p5 }
 0x177   : > { %p638_p1 = pnand %p637_p11, %p631_p6 }
 0x179   : > { %641 = shalt.err (!%p638_p1)
}
 0x17a   : > { %478 = dma.vmem_to_hbm [thread:$0]  (%p966_p10), %s891_s23, 256, %s896_s29, %s334_s5  }
 0x17b PF: > { %s362_s4 = sand.u32 1, %s680_s9   ;;  %p967_p0 = scmp.ne.s32.totalorder %s956_s22, 0 }
 0x17c   : > { %p968_p9 = scmp.ge.s32.totalorder %s700_s14, 2  ;;  %s363_s18 = scalar_lea.sflag [#allocation4], %s362_s4 }
 0x17e   : > { %p489_p3 = pnand %p968_p9, %p967_p0 }
 0x180   : > { %675 = dma.done.wait (!%p489_p3), %s363_s18, 256  }
 0x181   : > { %677 = vsyncadd (!%p489_p3), %s363_s18, 4294967040  ;;  %s19_s14 = sadd.s32 1, %s700_s14   ;;  %s969_s9 = smov %s684_s10 }
 0x182   : > { %p16_p7 = scmp.ge.s32.totalorder %s19_s14, 4   ;;  %s970_s10 = smov %s688_s11 }
 0x183   : > { %s971_s11 = smov %s842_s25  ;;  %s972_s12 = smov %s696_s13 }
 0x184   : > { %s973_s13 = smov %s975_s28  ;;  %18 = sbr.rel (!%p16_p7) target bundleno = 7 (0x7), region = 77 }
 0x18b   :  { %368 = vsyncpa [#allocation3], 1 }
 0x18c   :  { %370 = vsyncpa [#allocation3 + $0x1], 1 }
 0x18d   :  { %371 = vsyncpa [#allocation6], 1 }
 0x18e   :  { %372 = vsyncpa [#allocation4], 1 }
 0x18f   :  { %374 = vsyncpa [#allocation4 + $0x1], 1 }

</bundles_post_ra>
